<compile_context>
chip_gen: v5e
topology: v5e:2x2
jax: 0.10.0
libtpu: 0.0.40
codegen_flags: <defaults>
</compile_context>

<pallas_src>
import functools

import jax
import jax.numpy as jnp
from jax import lax
from jax.experimental import pallas as pl
from jax.experimental.pallas import tpu as pltpu


def _round_up(x: int, m: int) -> int:
    return (x + m - 1) // m * m


def _lgm_kernel(feat_ref, cent_t_ref, fn2_ref, cn2_ref, label_ref,
                logits_ref, margin_ref, *, alpha: float, tile_c: int):
    # feat_ref   : (TB, D)   matmul dtype
    # cent_t_ref : (D, TC)   matmul dtype (centers pre-transposed in wrapper)
    # fn2_ref    : (TB, 1)   f32, -0.5 * ||feat||^2
    # cn2_ref    : (1, Cp)   f32, -0.5 * ||centers||^2, resident (fetched once)
    # label_ref  : (TB, 1)   int32
    # logits_ref / margin_ref : (TB, TC) out_dtype tiles
    cross = lax.dot_general(
        feat_ref[...], cent_t_ref[...], (((1,), (0,)), ((), ())),
        preferred_element_type=jnp.float32)                     # (TB, TC) on MXU

    col0 = pl.multiple_of(pl.program_id(1) * tile_c, 128)
    cn2 = cn2_ref[:, pl.ds(col0, tile_c)]                       # (1, TC)

    # logits = -0.5*dist = (f.c) - 0.5*||f||^2 - 0.5*||c||^2
    logits = cross + fn2_ref[...] + cn2
    logits = jnp.minimum(logits, 0.0)   # dist >= 0 (guards FP cancellation)
    logits_ref[...] = logits.astype(logits_ref.dtype)

    # margin_logits = logits * (1 + alpha * onehot(label)) via a select on the
    # label column; offset moved to a (TB,1) scalar subtract.
    local_label = label_ref[...] - col0                         # (TB, 1)
    class_ids = lax.broadcasted_iota(jnp.int32, logits.shape, 1)
    is_label = class_ids == local_label                         # (TB, TC)
    margin_ref[...] = jnp.where(is_label, (1.0 + alpha) * logits,
                                logits).astype(margin_ref.dtype)


def _footprint_bytes(tb, tc, d, cp, mm_bytes, out_bytes):
    per_step = (tb * d * mm_bytes            # feat tile
                + d * tc * mm_bytes          # centers^T tile
                + 2 * tb * tc * out_bytes    # logits + margin tiles
                + 2 * tb * 128 * 4)          # fn2 + label, lane-padded (TB,1)
    resident = 8 * cp * 4                    # cn2, sublane-padded (1, Cp)
    return 2 * per_step + 2 * resident       # double-buffering depth 2


def _pick_tiles(B, C, D, mm_bytes, out_bytes, budget=32 << 20):
    # Large tiles amortize the ~0.35 us per-grid-step overhead and cut centers
    # re-streaming; the D-aware loop keeps the double-buffered footprint inside
    # the budget (safe for v7x's 64 MiB per-TC VMEM, the tightest generation).
    tb = min(_round_up(B, 16), 1024)
    tc = min(_round_up(C, 128), 1024)
    while (_footprint_bytes(tb, tc, D, _round_up(C, tc), mm_bytes, out_bytes)
           > budget) and (tb > 16 or tc > 128):
        tb_cost = tb * D * mm_bytes + 2 * tb * tc * out_bytes
        tc_cost = D * tc * mm_bytes + 2 * tb * tc * out_bytes
        if tb > 16 and (tb_cost >= tc_cost or tc <= 128):
            tb = max(16, _round_up(tb // 2, 16))
        else:
            tc = max(128, _round_up(tc // 2, 128))
    return tb, tc


def _vmem_limit_bytes(tb, tc, d, cp, mm_bytes, out_bytes):
    est = _footprint_bytes(tb, tc, d, cp, mm_bytes, out_bytes)
    # 1.5x headroom, floored at 16 MiB, capped below v7x physical VMEM (64 MiB).
    return int(min(max(int(1.5 * est), 16 << 20), 48 << 20))


def lgm_loss_v0(feat, label, centers, alpha, *,
                matmul_dtype=jnp.float32, out_dtype=jnp.float32):
    """Pallas implementation of LGMLoss_v0.forward (only_likelihood=False,
    keepdim=False).  Returns (logits, margin_logits, likelihood).

    matmul_dtype/out_dtype=jnp.bfloat16 is the fast path (halves the dominant
    B*C HBM output writeback); the f32 defaults keep reference accuracy."""
    feat32 = feat.astype(jnp.float32)
    centers32 = centers.astype(jnp.float32)
    B, D = feat32.shape
    C, Dc = centers32.shape
    assert D == Dc
    label1d = label.astype(jnp.int32).reshape(B)

    mm_bytes = jnp.dtype(matmul_dtype).itemsize
    out_bytes = jnp.dtype(out_dtype).itemsize
    TB, TC = _pick_tiles(B, C, D, mm_bytes, out_bytes)
    # TODO(synk): for extreme feat_dim where even (16, 128) tiles exceed the
    # VMEM budget, add a K ("arbitrary") grid axis with an f32 VMEM accumulator.
    Bp = _round_up(B, TB)
    Cp = _round_up(C, TC)

    # Norm terms (with -0.5 folded in) precomputed once in f32; the kernel's MXU
    # only does the cross term.  centers pre-transposed once -> no per-step XLU
    # transpose inside the kernel.
    fn2 = -0.5 * jnp.sum(feat32 * feat32, axis=1, keepdims=True)           # (B,1)
    cn2 = -0.5 * jnp.sum(centers32 * centers32, axis=1, keepdims=True).T   # (1,C)

    feat_mm = feat32.astype(matmul_dtype)
    cent_t_mm = centers32.T.astype(matmul_dtype)                           # (D,C)

    def pad2(x, rpad, cpad, value=0):
        if rpad == 0 and cpad == 0:
            return x
        return jnp.pad(x, ((0, rpad), (0, cpad)), constant_values=value)

    feat_mm = pad2(feat_mm, Bp - B, 0)
    cent_t_mm = pad2(cent_t_mm, 0, Cp - C)
    fn2_p = pad2(fn2, Bp - B, 0)
    cn2_p = pad2(cn2, 0, Cp - C)
    # Padded rows get label -1 so they can never match a class column.
    label_p = pad2(label1d.reshape(B, 1), Bp - B, 0, value=-1)

    kernel = functools.partial(_lgm_kernel, alpha=float(alpha), tile_c=TC)

    grid = (Bp // TB, Cp // TC)      # B outer, C inner (feat tile reused over C)
    cost = pl.CostEstimate(
        flops=int(2 * Bp * Cp * D),
        transcendentals=0,
        bytes_accessed=int(Bp * D * mm_bytes
                           + (Bp // TB) * Cp * D * mm_bytes   # centers re-stream
                           + 2 * Bp * Cp * out_bytes
                           + Bp * 8 + Cp * 4))

    logits_p, margin_p = pl.pallas_call(
        kernel,
        grid=grid,
        out_shape=(
            jax.ShapeDtypeStruct((Bp, Cp), out_dtype),   # logits
            jax.ShapeDtypeStruct((Bp, Cp), out_dtype),   # margin_logits
        ),
        in_specs=[
            pl.BlockSpec((TB, D), lambda i, j: (i, 0)),    # feat (reused over j)
            pl.BlockSpec((D, TC), lambda i, j: (0, j)),    # centers^T
            pl.BlockSpec((TB, 1), lambda i, j: (i, 0)),    # -0.5*||f||^2
            pl.BlockSpec((1, Cp), lambda i, j: (0, 0)),    # -0.5*||c||^2, resident
            pl.BlockSpec((TB, 1), lambda i, j: (i, 0)),    # labels
        ],
        out_specs=(
            pl.BlockSpec((TB, TC), lambda i, j: (i, j)),
            pl.BlockSpec((TB, TC), lambda i, j: (i, j)),
        ),
        compiler_params=pltpu.CompilerParams(
            dimension_semantics=("parallel", "parallel"),
            vmem_limit_bytes=_vmem_limit_bytes(TB, TC, D, Cp, mm_bytes, out_bytes),
        ),
        cost_estimate=cost,
    )(feat_mm, cent_t_mm, fn2_p, cn2_p, label_p)

    logits = logits_p[:B, :C]
    margin_logits = margin_p[:B, :C]

    # likelihood = (1/(2B)) * sum_b ||feat[b] - centers[label[b]]||^2, computed
    # exactly in f32 from an O(B*D) gather of centers (matches PyTorch; avoids
    # re-reading the (B,C) logits from HBM).
    cdiff = feat32 - centers32[label1d]
    likelihood = jnp.sum(cdiff * cdiff) / (2.0 * B)

    return logits, margin_logits, likelihood


def init_centers(key, num_classes, feat_dim):
    """kaiming_normal_(mode='fan_out', nonlinearity='leaky_relu') init.

    For a 2D parameter (num_classes, feat_dim): fan_out = num_classes,
    gain = sqrt(2 / (1 + 0.01**2)), std = gain / sqrt(fan_out)."""
    gain = (2.0 / (1.0 + 0.01 ** 2)) ** 0.5
    std = gain / (num_classes ** 0.5)
    return jax.random.normal(key, (num_classes, feat_dim), dtype=jnp.float32) * std


if __name__ == "__main__":
    # Small, deterministic example: batch=8, num_classes=10, feat_dim=32, alpha=0.1
    batch, num_classes, feat_dim, alpha = 8, 10, 32, 0.1

    key = jax.random.PRNGKey(0)
    k_feat, k_centers, k_label = jax.random.split(key, 3)

    feat = jax.random.normal(k_feat, (batch, feat_dim), dtype=jnp.float32)
    label = jax.random.randint(k_label, (batch,), 0, num_classes, dtype=jnp.int32)
    centers = init_centers(k_centers, num_classes, feat_dim)

    # Exact f32 path (default).
    logits, margin_logits, likelihood = lgm_loss_v0(feat, label, centers, alpha)
    jax.block_until_ready((logits, margin_logits, likelihood))

    # Pure-JAX f32 reference of the same math.
    diff = feat[:, None, :] - centers[None, :, :]
    dist_ref = jnp.sum(diff * diff, axis=-1)
    onehot_ref = 1.0 + alpha * jax.nn.one_hot(label, num_classes, dtype=jnp.float32)
    logits_ref = -0.5 * dist_ref
    margin_ref = -0.5 * dist_ref * onehot_ref
    cdiff_ref = feat - centers[label]
    like_ref = (1.0 / batch) * jnp.sum(cdiff_ref ** 2) / 2.0

    assert jnp.allclose(logits, logits_ref, atol=1e-4, rtol=1e-4)
    assert jnp.allclose(margin_logits, margin_ref, atol=1e-4, rtol=1e-4)
    assert jnp.allclose(likelihood, like_ref, atol=1e-5, rtol=1e-5)

    # bf16 fast path (halves the B*C output writeback); looser tolerance for the
    # bf16 MXU inputs + bf16 output rounding.  Likelihood stays exact (f32).
    lg_bf, mg_bf, lk_bf = lgm_loss_v0(feat, label, centers, alpha,
                                      matmul_dtype=jnp.bfloat16,
                                      out_dtype=jnp.bfloat16)
    jax.block_until_ready((lg_bf, mg_bf, lk_bf))
    assert jnp.allclose(lg_bf.astype(jnp.float32), logits_ref, atol=2.5e-1, rtol=3e-2)
    assert jnp.allclose(mg_bf.astype(jnp.float32), margin_ref, atol=2.5e-1, rtol=3e-2)
    assert jnp.allclose(lk_bf, like_ref, atol=1e-5, rtol=1e-5)

    print("KERNEL_OK")
</pallas_src>

<mosaic_0001>
module attributes {stable_mosaic.version = 11 : i64} {
  func.func @_lgm_kernel(%arg0: i32, %arg1: i32, %arg2: memref<16x32xf32, #tpu.memory_space<vmem>>, %arg3: memref<32x128xf32, #tpu.memory_space<vmem>>, %arg4: memref<16x1xf32, #tpu.memory_space<vmem>>, %arg5: memref<1x128xf32, #tpu.memory_space<vmem>>, %arg6: memref<16x1xi32, #tpu.memory_space<vmem>>, %arg7: memref<16x128xf32, #tpu.memory_space<vmem>>, %arg8: memref<16x128xf32, #tpu.memory_space<vmem>>) attributes {dimension_semantics = [#tpu.dimension_semantics<parallel>, #tpu.dimension_semantics<parallel>], iteration_bounds = array<i64: 1, 1>, scalar_prefetch = 0 : i64, scratch_operands = 0 : i64, tpu.core_type = #tpu.core_type<tc>, window_params = [{transform_indices = @transform_0, window_bounds = array<i64: 16, 32>}, {transform_indices = @transform_1, window_bounds = array<i64: 32, 128>}, {transform_indices = @transform_2, window_bounds = array<i64: 16, 1>}, {pipeline_mode = #tpu.pipeline_mode<synchronous>, transform_indices = @transform_3, window_bounds = array<i64: 1, 128>}, {transform_indices = @transform_4, window_bounds = array<i64: 16, 1>}, {transform_indices = @transform_5, window_bounds = array<i64: 16, 128>}, {transform_indices = @transform_6, window_bounds = array<i64: 16, 128>}]} {
    %c0 = arith.constant 0 : index
    %c0_0 = arith.constant 0 : index
    %0 = vector.load %arg2[%c0, %c0_0] : memref<16x32xf32, #tpu.memory_space<vmem>>, vector<16x32xf32>
    %c0_1 = arith.constant 0 : index
    %c0_2 = arith.constant 0 : index
    %1 = vector.load %arg3[%c0_1, %c0_2] : memref<32x128xf32, #tpu.memory_space<vmem>>, vector<32x128xf32>
    %cst = arith.constant dense<0.000000e+00> : vector<16x128xf32>
    %2 = tpu.matmul %0, %1, %cst {dimension_numbers = #tpu.dot_dimension_numbers<[1], [0], [0], [1], [0, 0, 1, 1], [], []>} : vector<16x32xf32>, vector<32x128xf32>, vector<16x128xf32> -> vector<16x128xf32>
    %c128_i32 = arith.constant 128 : i32
    %3 = arith.muli %arg1, %c128_i32 : i32
    %4 = tpu.assume_multiple %3, 128 : i32
    %c0_3 = arith.constant 0 : index
    %5 = arith.index_cast %4 : i32 to index
    %6 = vector.load %arg5[%c0_3, %5] : memref<1x128xf32, #tpu.memory_space<vmem>>, vector<1x128xf32>
    %c0_4 = arith.constant 0 : index
    %c0_5 = arith.constant 0 : index
    %7 = vector.load %arg4[%c0_4, %c0_5] : memref<16x1xf32, #tpu.memory_space<vmem>>, vector<16x1xf32>
    %8 = vector.broadcast %7 : vector<16x1xf32> to vector<16x128xf32>
    %9 = arith.addf %2, %8 : vector<16x128xf32>
    %10 = vector.broadcast %6 : vector<1x128xf32> to vector<16x128xf32>
    %11 = arith.addf %9, %10 : vector<16x128xf32>
    %cst_6 = arith.constant 0.000000e+00 : f32
    %12 = vector.broadcast %cst_6 : f32 to vector<16x128xf32>
    %13 = arith.minimumf %11, %12 : vector<16x128xf32>
    %c0_7 = arith.constant 0 : index
    %c0_8 = arith.constant 0 : index
    %14 = vector.load %arg7[%c0_7, %c0_8] : memref<16x128xf32, #tpu.memory_space<vmem>>, vector<16x128xf32>
    tpu.vector_store %arg7[%c0_7, %c0_8], %13 {strides = array<i32>} : memref<16x128xf32, #tpu.memory_space<vmem>>, vector<16x128xf32>,
    %c0_9 = arith.constant 0 : index
    %c0_10 = arith.constant 0 : index
    %15 = vector.load %arg6[%c0_9, %c0_10] : memref<16x1xi32, #tpu.memory_space<vmem>>, vector<16x1xi32>
    %16 = vector.broadcast %4 : i32 to vector<16x1xi32>
    %17 = arith.subi %15, %16 : vector<16x1xi32>
    %18 = tpu.iota {dimensions = array<i32: 1>} : vector<16x128xi32>
    %19 = vector.broadcast %17 : vector<16x1xi32> to vector<16x128xi32>
    %20 = arith.cmpi eq, %18, %19 : vector<16x128xi32>
    %cst_11 = arith.constant 1.100000e+00 : f32
    %21 = vector.broadcast %cst_11 : f32 to vector<16x128xf32>
    %22 = arith.mulf %21, %13 : vector<16x128xf32>
    %23 = arith.select %20, %22, %13 : vector<16x128xi1>, vector<16x128xf32>
    %c0_12 = arith.constant 0 : index
    %c0_13 = arith.constant 0 : index
    %24 = vector.load %arg8[%c0_12, %c0_13] : memref<16x128xf32, #tpu.memory_space<vmem>>, vector<16x128xf32>
    tpu.vector_store %arg8[%c0_12, %c0_13], %23 {strides = array<i32>} : memref<16x128xf32, #tpu.memory_space<vmem>>, vector<16x128xf32>,
    return
  }
  func.func @transform_0(%arg0: i32, %arg1: i32) -> (i32, i32) {
    %c0_i32 = arith.constant 0 : i32
    %c0_i32_0 = arith.constant 0 : i32
    return %arg0, %c0_i32 : i32, i32
  }
  func.func @transform_1(%arg0: i32, %arg1: i32) -> (i32, i32) {
    %c0_i32 = arith.constant 0 : i32
    %c0_i32_0 = arith.constant 0 : i32
    return %c0_i32, %arg1 : i32, i32
  }
  func.func @transform_2(%arg0: i32, %arg1: i32) -> (i32, i32) {
    %c0_i32 = arith.constant 0 : i32
    %c0_i32_0 = arith.constant 0 : i32
    return %arg0, %c0_i32 : i32, i32
  }
  func.func @transform_3(%arg0: i32, %arg1: i32) -> (i32, i32) {
    %c0_i32 = arith.constant 0 : i32
    %c0_i32_0 = arith.constant 0 : i32
    %c0_i32_1 = arith.constant 0 : i32
    return %c0_i32, %c0_i32_0 : i32, i32
  }
  func.func @transform_4(%arg0: i32, %arg1: i32) -> (i32, i32) {
    %c0_i32 = arith.constant 0 : i32
    %c0_i32_0 = arith.constant 0 : i32
    return %arg0, %c0_i32 : i32, i32
  }
  func.func @transform_5(%arg0: i32, %arg1: i32) -> (i32, i32) {
    %c0_i32 = arith.constant 0 : i32
    return %arg0, %arg1 : i32, i32
  }
  func.func @transform_6(%arg0: i32, %arg1: i32) -> (i32, i32) {
    %c0_i32 = arith.constant 0 : i32
    return %arg0, %arg1 : i32, i32
  }
}

</mosaic_0001>

<bundles_post_ra>
// kernel: tpu_custom_call.1
= control target key start
LH: loop header
LB: loop body
LE: loop exit
PB: predicated region body
PF: predicated region fallthrough
CT: control target
= control target key end

     0   :  { %12 = vsyncpa [#allocation3], 0  ;;  %s340_s0 = inlined_call_operand.hbm [shape: f32[16,32], index: 0, kind: input, shape index: {}]   ;;  %s341_s1 = inlined_call_operand.vmem [shape: f32[32,128], index: 1, kind: input, shape index: {}]   ;;  %s342_s2 = inlined_call_operand.vmem [shape: f32[16,1], index: 2, kind: input, shape index: {}]   ;;  %s343_s3 = inlined_call_operand.vmem [shape: f32[1,128], index: 3, kind: input, shape index: {}]   ;;  %s344_s4 = inlined_call_operand.vmem [shape: s32[16,1], index: 4, kind: input, shape index: {}]   ;;  %s345_s5 = inlined_call_operand.hbm [shape: f32[16,128], index: 5, kind: output, shape index: {0}]   ;;  %s346_s6 = inlined_call_operand.hbm [shape: f32[16,128], index: 6, kind: output, shape index: {1}]  }
   0x1   :  { %13 = vsyncpa [#allocation4], 0 }
   0x2   :  { %14 = vsyncpa [#allocation7], 0  ;;  %s19_s23 = sshll.u32 %s340_s0, 4  ;;  %s254_s24 = smov [#allocation2]   ;;  %s20_s23 = int_to_ptr.hbm [resolvable:$true] %s19_s23 }
   0x3   :  { %s21_s25 = sshll.u32 %s254_s24, 4  ;;  %s255_s26 = smov 128   ;;  %s22_s25 = int_to_ptr.vmem [resolvable:$true] %s21_s25 }
   0x4   :  { %s256_s27 = smov 8  }
   0x5   :  { %27 = dma.hbm_to_vmem [thread:$0]  %s20_s23, 256, %s22_s25, [#allocation3], %s255_s26, %s255_s26, %s256_s27  }
   0x6   :  { %248 = dma.done.wait [#allocation3], 256  }
   0x7   :  { %249 = vsyncadd [#allocation3], 4294967040  ;;  %v257_v0 = vmov 0   ;;  %v45_v1 = vld [vmem:[%s341_s1 + $0x18] sm:$0xff]  ;;  %v51_v2 = vld [vmem:[%s342_s2] sm:$0xff]  ;;  %vm63_vm0 = vcmask 261120   ;;  %v107_v15 = vlaneseq }
   0x8   :  { %173 = vset.pattern.permute.xlu0 %v257_v0  ;;  %174 = vset.pattern.permute.xlu1 %v257_v0  ;;  %v44_v3 = vld [vmem:[%s341_s1 + $0x10] sm:$0xff]  ;;  %v43_v4 = vld [vmem:[%s341_s1 + $0x8] sm:$0xff]  ;;  %v102_v5 = vld [vmem:[%s344_s4] sm:$0xff]  ;;  %s129_s22 = sshll.u32 %s345_s5, 4  ;;  %s259_s23 = smov [#allocation6]   ;;  %s130_s22 = int_to_ptr.hbm [resolvable:$true] %s129_s22 }
   0x9   :  { %82 = vmatpush.msra.mxu0 %v45_v1  ;;  %163 = vmatpush.msra.mxu1 %v45_v1  ;;  %v42_v6 = vld [vmem:[%s341_s1] sm:$0xff]  ;;  %v41_v8 = vld [vmem:[#allocation2 + $0x8] sm:$0xff]  ;;  %v108_v22 = vand.u32 127, %v107_v15  ;;  %s140_s24 = sshll.u32 %s259_s23, 4  ;;  %s142_s28 = sshll.u32 %s346_s6, 4  ;;  %s141_s24 = int_to_ptr.vmem [resolvable:$true] %s140_s24  ;;  %s143_s28 = int_to_ptr.hbm [resolvable:$true] %s142_s28 }
   0xa   :  { %55 = vperm.xlu0 %173, %v51_v2   ;;  %110 = vperm.xlu1 %174, %v102_v5   ;;  %v40_v7 = vld [vmem:[#allocation2] sm:$0xff]  ;;  %v52_v9 = vld [vmem:[%s342_s2 + $0x8] sm:$0xff]  ;;  %s258_s2 = smov [#allocation5]  }
   0xb   :  { %83 = vmatpush.msra.mxu0 %v44_v3  ;;  %164 = vmatpush.msra.mxu1 %v44_v3  ;;  %v103_v10 = vld [vmem:[%s344_s4 + $0x8] sm:$0xff]  ;;  %v175_v14 = vld [vmem:[%s343_s3] ss:$0 sm:$0xff]  ;;  %s127_s20 = sshll.u32 %s258_s2, 4  ;;  %s128_s20 = int_to_ptr.vmem [resolvable:$true] %s127_s20 }
   0xd   :  { %84 = vmatpush.msra.mxu0 %v43_v4  ;;  %165 = vmatpush.msra.mxu1 %v43_v4 }
   0xf   :  { %85 = vmatpush.msra.mxu0 %v42_v6  ;;  %166 = vmatpush.msra.mxu1 %v42_v6 }
  0x10   :  { %161 = vmatmul.msk.f32.vlgmr.msra.gmra.mxu0 %vm63_vm0, %v40_v7  ;;  %162 = vmatmul.msk.f32.vlgmr.msra.gmra.mxu1 %vm63_vm0, %v41_v8 }
  0x12   :  { %60 = vperm.xlu0 %173, %v52_v9   ;;  %113 = vperm.xlu1 %174, %v103_v10  }
  0x7c   :  { %v56_v11 = vpop.permute.xlu0 %55  ;;  %v111_v12 = vpop.permute.xlu1 %110 }
  0x7d   :  { %vm115_vm1 = vcmp.eq.s32.totalorder %v108_v22, %v111_v12 }
  0x84   :  { %v61_v13 = vpop.permute.xlu0 %60  ;;  %v114_v23 = vpop.permute.xlu1 %113 }
  0x85   :  { %vm116_vm2 = vcmp.eq.s32.totalorder %v108_v22, %v114_v23 }
  0x8d   :  { %v87_v16 = vpop.f32.mrf.mxu0  ;;  %v90_v17 = vpop.f32.mrf.mxu1 }
  0x8e   :  { %v88_v18 = vadd.f32 %v87_v16, %v56_v11  ;;  %v91_v19 = vadd.f32 %v90_v17, %v61_v13 }
  0x90   :  { %v96_v20 = vadd.f32 %v175_v14, %v88_v18  ;;  %v97_v21 = vadd.f32 %v175_v14, %v91_v19 }
  0x92   :  { %v98_v24 = vmin.f32 %v96_v20, 0.0  ;;  %v99_v25 = vmin.f32 %v97_v21, 0.0 }
  0x94   :  { %v117_v26 = vmul.f32 1.1, %v98_v24  ;;  %100 = vst [vmem:[#allocation5] sm:$0xff] %v98_v24  ;;  %v118_v27 = vmul.f32 1.1, %v99_v25 }
  0x95   :  { %101 = vst [vmem:[#allocation5 + $0x8] sm:$0xff] %v99_v25 }
  0x96   :  { %135 = dma.vmem_to_hbm [thread:$0]  %s128_s20, 256, %s130_s22, [#allocation4], %s255_s26, %s255_s26, %s256_s27   ;;  %v119_v28 = vsel %vm115_vm1, %v117_v26, %v98_v24  ;;  %v120_v29 = vsel %vm116_vm2, %v118_v27, %v99_v25 }
  0x97   :  { %121 = vst [vmem:[#allocation6] sm:$0xff] %v119_v28 }
  0x98   :  { %122 = vst [vmem:[#allocation6 + $0x8] sm:$0xff] %v120_v29 }
  0x99   :  { %148 = dma.vmem_to_hbm [thread:$0]  %s141_s24, 256, %s143_s28, [#allocation7], %s255_s26, %s255_s26, %s256_s27  }
  0x9a   :  { %250 = dma.done.wait [#allocation4], 256  }
  0x9b   :  { %251 = vsyncadd [#allocation4], 4294967040 }
  0x9c   :  { %252 = dma.done.wait [#allocation7], 256  }
  0x9d   :  { %253 = vsyncadd [#allocation7], 4294967040 }
  0x9e   :  { %157 = vsyncpa [#allocation3], 1 }
  0x9f   :  { %158 = vsyncpa [#allocation4], 1 }
  0xa0   :  { %159 = vsyncpa [#allocation7], 1 }

</bundles_post_ra>
